<compile_context>
chip_gen: v5e
topology: v5e:2x2
jax: 0.10.0
libtpu: 0.0.40
codegen_flags: <defaults>
</compile_context>

<pallas_src>
import functools

import jax
import jax.numpy as jnp
import numpy as np
from jax import lax
from jax.experimental import pallas as pl
from jax.experimental.pallas import tpu as pltpu


def _random_shift_kernel(shift_ref, x_ref, o_ref, pscr0, pscr1, *, pad):
    # shift_ref: (2*N,) int32 in SMEM (scalar prefetch): [sx0, sy0, sx1, sy1, ...]
    # x_ref:     (NB, C, H, W) input block in VMEM
    # o_ref:     (NB, C, H, W) output block in VMEM
    # pscr0/1:   (C, H + 2*pad, W) ping-pong scratch, replicate-padded along H only
    nb, c, h, w = x_ref.shape
    g = pl.program_id(0)

    # nb is small (<= 8), so a static Python loop is used: the ping-pong slot is
    # a compile-time constant and the per-image bodies can interleave.
    for i in range(nb):
        b = g * nb + i
        # Shifts live in [0, 2*pad]; clamp defensively (no VMEM bounds checks).
        sx = jnp.clip(shift_ref[2 * b], 0, 2 * pad)      # width  (x) shift
        sy = jnp.clip(shift_ref[2 * b + 1], 0, 2 * pad)  # height (y) shift

        img = x_ref[i]                                   # (C, H, W)
        slot = pscr0 if (i % 2 == 0) else pscr1          # ping-pong scratch

        # ---- replicate-pad along H only (every store spans the full W lanes,
        #      halos come straight from img — nothing is read back) ----
        slot[:, pad:pad + h, :] = img
        if pad > 0:
            slot[:, :pad, :] = jnp.broadcast_to(img[:, :1, :], (c, pad, w))
            slot[:, pad + h:, :] = jnp.broadcast_to(img[:, h - 1:h, :], (c, pad, w))

        # ---- row crop: dynamic sublane window driven by the prefetched shift ----
        rows = slot[:, pl.ds(sy, h), :]                  # (C, H, W)

        # ---- column crop ----
        # W replicate-pad is built in registers (no scratch round-trip, no
        # masked stores), then the w-wide window at offset sx is selected.
        # (A dynamic pltpu.roll would be preferable but needs a 128-multiple
        # minor dim to lower in Mosaic, which W / W+2*pad are not.)
        if pad > 0:
            wide = jnp.concatenate(
                [jnp.broadcast_to(rows[:, :, :1], (c, h, pad)),
                 rows,
                 jnp.broadcast_to(rows[:, :, w - 1:], (c, h, pad))],
                axis=2)                                  # (C, H, W + 2*pad)
        else:
            wide = rows

        out = wide[:, :, 0:w]
        for s in range(1, 2 * pad + 1):
            out = jnp.where(sx >= s, wide[:, :, s:s + w], out)

        o_ref[i] = out.astype(o_ref.dtype)


def _ceil_to(x, m):
    return -(-x // m) * m


def _padded_bytes(c, h, w, itemsize):
    # VMEM rounds the minor two dims up to the (8, 128) register tile.
    return c * _ceil_to(h, 8) * _ceil_to(w, 128) * itemsize


def _pick_block_batch(n, c, h, w, pad, itemsize,
                      block_budget_bytes=8 * 1024 * 1024, max_nb=8):
    """Images per grid step.

    in/out blocks are each double-buffered by the Pallas pipeline; the two
    ping-pong scratch slots are budgeted explicitly.  Prefer the largest block
    that keeps >= 4 grid steps with an even count (v7x megacore parity plus
    pipeline overlap), then >= 2 steps, then anything.
    """
    img = _padded_bytes(c, h, w, itemsize)
    scratch = 2 * _padded_bytes(c, h + 2 * pad, w, itemsize)
    budget = max(block_budget_bytes - scratch, 4 * img)
    cap = min(max_nb, max(1, budget // (4 * img)))
    divisors = [d for d in range(1, n + 1) if n % d == 0 and d <= cap]
    for pred in (lambda steps: steps >= 4 and steps % 2 == 0,
                 lambda steps: steps >= 2,
                 lambda steps: True):
        good = [d for d in divisors if pred(n // d)]
        if good:
            return max(good)
    return 1


def random_shifts_aug(x, shift, pad):
    """x: (N, C, H, W) float; shift: (N, 2) int32 in [0, 2*pad] ([:,0]=x, [:,1]=y).

    The torch module draws `shift` internally with torch.randint; here it is an
    explicit input (drawn on the host with jax.random) for determinism.
    """
    n, c, h, w = x.shape
    # The torch module derives its sampling grid from h only, so it requires
    # h == w; the crop formulation here is per-axis exact, but keep the assert.
    assert h == w
    itemsize = jnp.dtype(x.dtype).itemsize

    # Flat SMEM layout: [sx0, sy0, sx1, sy1, ...]  (review #4).
    shift_flat = shift.astype(jnp.int32).reshape(-1)

    nb = _pick_block_batch(n, c, h, w, pad, itemsize)
    hp = h + 2 * pad

    img_blk = _padded_bytes(c, h, w, itemsize)
    scratch_bytes = 2 * _padded_bytes(c, hp, w, itemsize)
    need = 4 * nb * img_blk + scratch_bytes + (1 << 20)
    vmem_limit = int(max(32 * 1024 * 1024, need))

    kernel = functools.partial(_random_shift_kernel, pad=pad)
    grid_spec = pltpu.PrefetchScalarGridSpec(
        num_scalar_prefetch=1,
        grid=(n // nb,),
        in_specs=[pl.BlockSpec((nb, c, h, w), lambda g, s: (g, 0, 0, 0))],
        out_specs=pl.BlockSpec((nb, c, h, w), lambda g, s: (g, 0, 0, 0)),
        scratch_shapes=[pltpu.VMEM((c, hp, w), x.dtype),
                        pltpu.VMEM((c, hp, w), x.dtype)],
    )
    return pl.pallas_call(
        kernel,
        out_shape=jax.ShapeDtypeStruct((n, c, h, w), x.dtype),
        grid_spec=grid_spec,
        compiler_params=pltpu.CompilerParams(
            dimension_semantics=("parallel",),
            vmem_limit_bytes=vmem_limit,
        ),
        cost_estimate=pl.CostEstimate(
            flops=0,
            transcendentals=0,
            bytes_accessed=2 * n * c * h * w * itemsize,
        ),
    )(shift_flat, x)


if __name__ == "__main__":
    key = jax.random.PRNGKey(0)
    n, c, h, w = 2, 4, 16, 16
    pad = 4

    kx, ks = jax.random.split(key)
    x = jax.random.normal(kx, (n, c, h, w), dtype=jnp.float32)
    # torch.randint(0, 2*pad + 1, size=(n, 1, 1, 2)) -> drawn on host instead.
    shift = jax.random.randint(ks, (n, 2), 0, 2 * pad + 1, dtype=jnp.int32)

    out = random_shifts_aug(x, shift, pad)
    jax.block_until_ready(out)

    # Reference: integer crop of the replicate-padded image (the kernel is pure
    # data movement, so the result must be bit-exact).
    xp = jnp.pad(x, ((0, 0), (0, 0), (pad, pad), (pad, pad)), mode="edge")
    ref = jnp.stack(
        [
            lax.dynamic_slice(xp[b], (0, int(shift[b, 1]), int(shift[b, 0])), (c, h, w))
            for b in range(n)
        ]
    )
    np.testing.assert_array_equal(np.asarray(out), np.asarray(ref))
    print("KERNEL_OK")
</pallas_src>

<mosaic_0001>
module attributes {stable_mosaic.version = 11 : i64} {
  func.func @_random_shift_kernel(%arg0: i32, %arg1: memref<4xi32, #tpu.memory_space<smem>>, %arg2: memref<1x4x16x16xf32, #tpu.memory_space<vmem>>, %arg3: memref<1x4x16x16xf32, #tpu.memory_space<vmem>>, %arg4: memref<4x24x16xf32, #tpu.memory_space<vmem>>, %arg5: memref<4x24x16xf32, #tpu.memory_space<vmem>>) attributes {dimension_semantics = [#tpu.dimension_semantics<parallel>], iteration_bounds = array<i64: 2>, scalar_prefetch = 1 : i64, scratch_operands = 2 : i64, tpu.core_type = #tpu.core_type<tc>, window_params = [{transform_indices = @transform_0, window_bounds = array<i64: 1, 4, 16, 16>}, {transform_indices = @transform_1, window_bounds = array<i64: 1, 4, 16, 16>}]} {
    %c1_i32 = arith.constant 1 : i32
    %0 = arith.muli %arg0, %c1_i32 : i32
    %c0_i32 = arith.constant 0 : i32
    %1 = arith.addi %0, %c0_i32 : i32
    %c2_i32 = arith.constant 2 : i32
    %2 = arith.muli %c2_i32, %1 : i32
    %3 = arith.index_cast %2 : i32 to index
    %4 = memref.load %arg1[%3] : memref<4xi32, #tpu.memory_space<smem>>
    %c0_i32_0 = arith.constant 0 : i32
    %c8_i32 = arith.constant 8 : i32
    %5 = arith.maxsi %c0_i32_0, %4 : i32
    %6 = arith.minsi %c8_i32, %5 : i32
    %c2_i32_1 = arith.constant 2 : i32
    %7 = arith.muli %c2_i32_1, %1 : i32
    %c1_i32_2 = arith.constant 1 : i32
    %8 = arith.addi %7, %c1_i32_2 : i32
    %9 = arith.index_cast %8 : i32 to index
    %10 = memref.load %arg1[%9] : memref<4xi32, #tpu.memory_space<smem>>
    %c0_i32_3 = arith.constant 0 : i32
    %c8_i32_4 = arith.constant 8 : i32
    %11 = arith.maxsi %c0_i32_3, %10 : i32
    %12 = arith.minsi %c8_i32_4, %11 : i32
    %c0 = arith.constant 0 : index
    %c0_5 = arith.constant 0 : index
    %c0_6 = arith.constant 0 : index
    %c0_7 = arith.constant 0 : index
    %13 = vector.load %arg2[%c0, %c0_5, %c0_6, %c0_7] : memref<1x4x16x16xf32, #tpu.memory_space<vmem>>, vector<1x4x16x16xf32>
    %14 = vector.shape_cast %13 : vector<1x4x16x16xf32> to vector<4x16x16xf32>
    %c0_8 = arith.constant 0 : index
    %c4 = arith.constant 4 : index
    %c0_9 = arith.constant 0 : index
    %15 = vector.load %arg4[%c0_8, %c4, %c0_9] : memref<4x24x16xf32, #tpu.memory_space<vmem>>, vector<4x16x16xf32>
    tpu.vector_store %arg4[%c0_8, %c4, %c0_9], %14 {strides = array<i32>} : memref<4x24x16xf32, #tpu.memory_space<vmem>>, vector<4x16x16xf32>,
    %16 = vector.extract_strided_slice %14 {offsets = [0, 0, 0], sizes = [4, 1, 16], strides = [1, 1, 1]} : vector<4x16x16xf32> to vector<4x1x16xf32>
    %17 = vector.shape_cast %16 : vector<4x1x16xf32> to vector<4x1x16xf32>
    %18 = vector.broadcast %17 : vector<4x1x16xf32> to vector<4x4x16xf32>
    %c0_10 = arith.constant 0 : index
    %c0_11 = arith.constant 0 : index
    %c0_12 = arith.constant 0 : index
    %19 = vector.load %arg4[%c0_10, %c0_11, %c0_12] : memref<4x24x16xf32, #tpu.memory_space<vmem>>, vector<4x4x16xf32>
    tpu.vector_store %arg4[%c0_10, %c0_11, %c0_12], %18 {strides = array<i32>} : memref<4x24x16xf32, #tpu.memory_space<vmem>>, vector<4x4x16xf32>,
    %20 = vector.extract_strided_slice %14 {offsets = [0, 15, 0], sizes = [4, 1, 16], strides = [1, 1, 1]} : vector<4x16x16xf32> to vector<4x1x16xf32>
    %21 = vector.shape_cast %20 : vector<4x1x16xf32> to vector<4x1x16xf32>
    %22 = vector.broadcast %21 : vector<4x1x16xf32> to vector<4x4x16xf32>
    %c0_13 = arith.constant 0 : index
    %c20 = arith.constant 20 : index
    %c0_14 = arith.constant 0 : index
    %23 = vector.load %arg4[%c0_13, %c20, %c0_14] : memref<4x24x16xf32, #tpu.memory_space<vmem>>, vector<4x4x16xf32>
    tpu.vector_store %arg4[%c0_13, %c20, %c0_14], %22 {strides = array<i32>} : memref<4x24x16xf32, #tpu.memory_space<vmem>>, vector<4x4x16xf32>,
    %c0_15 = arith.constant 0 : index
    %24 = arith.index_cast %12 : i32 to index
    %c0_16 = arith.constant 0 : index
    %25 = vector.load %arg4[%c0_15, %24, %c0_16] : memref<4x24x16xf32, #tpu.memory_space<vmem>>, vector<4x16x16xf32>
    %26 = vector.extract_strided_slice %25 {offsets = [0, 0, 0], sizes = [4, 16, 1], strides = [1, 1, 1]} : vector<4x16x16xf32> to vector<4x16x1xf32>
    %27 = vector.shape_cast %26 : vector<4x16x1xf32> to vector<4x16x1xf32>
    %28 = vector.broadcast %27 : vector<4x16x1xf32> to vector<4x16x4xf32>
    %29 = vector.extract_strided_slice %25 {offsets = [0, 0, 15], sizes = [4, 16, 1], strides = [1, 1, 1]} : vector<4x16x16xf32> to vector<4x16x1xf32>
    %30 = vector.shape_cast %29 : vector<4x16x1xf32> to vector<4x16x1xf32>
    %31 = vector.broadcast %30 : vector<4x16x1xf32> to vector<4x16x4xf32>
    %32 = tpu.concatenate %28, %25, %31 in 2 : vector<4x16x4xf32>, vector<4x16x16xf32>, vector<4x16x4xf32> -> vector<4x16x24xf32>
    %33 = vector.extract_strided_slice %32 {offsets = [0, 0, 0], sizes = [4, 16, 16], strides = [1, 1, 1]} : vector<4x16x24xf32> to vector<4x16x16xf32>
    %c1_i32_17 = arith.constant 1 : i32
    %34 = arith.cmpi sge, %6, %c1_i32_17 : i32
    %35 = vector.extract_strided_slice %32 {offsets = [0, 0, 1], sizes = [4, 16, 16], strides = [1, 1, 1]} : vector<4x16x24xf32> to vector<4x16x16xf32>
    %36 = arith.select %34, %35, %33 : vector<4x16x16xf32>
    %c2_i32_18 = arith.constant 2 : i32
    %37 = arith.cmpi sge, %6, %c2_i32_18 : i32
    %38 = vector.extract_strided_slice %32 {offsets = [0, 0, 2], sizes = [4, 16, 16], strides = [1, 1, 1]} : vector<4x16x24xf32> to vector<4x16x16xf32>
    %39 = arith.select %37, %38, %36 : vector<4x16x16xf32>
    %c3_i32 = arith.constant 3 : i32
    %40 = arith.cmpi sge, %6, %c3_i32 : i32
    %41 = vector.extract_strided_slice %32 {offsets = [0, 0, 3], sizes = [4, 16, 16], strides = [1, 1, 1]} : vector<4x16x24xf32> to vector<4x16x16xf32>
    %42 = arith.select %40, %41, %39 : vector<4x16x16xf32>
    %c4_i32 = arith.constant 4 : i32
    %43 = arith.cmpi sge, %6, %c4_i32 : i32
    %44 = vector.extract_strided_slice %32 {offsets = [0, 0, 4], sizes = [4, 16, 16], strides = [1, 1, 1]} : vector<4x16x24xf32> to vector<4x16x16xf32>
    %45 = arith.select %43, %44, %42 : vector<4x16x16xf32>
    %c5_i32 = arith.constant 5 : i32
    %46 = arith.cmpi sge, %6, %c5_i32 : i32
    %47 = vector.extract_strided_slice %32 {offsets = [0, 0, 5], sizes = [4, 16, 16], strides = [1, 1, 1]} : vector<4x16x24xf32> to vector<4x16x16xf32>
    %48 = arith.select %46, %47, %45 : vector<4x16x16xf32>
    %c6_i32 = arith.constant 6 : i32
    %49 = arith.cmpi sge, %6, %c6_i32 : i32
    %50 = vector.extract_strided_slice %32 {offsets = [0, 0, 6], sizes = [4, 16, 16], strides = [1, 1, 1]} : vector<4x16x24xf32> to vector<4x16x16xf32>
    %51 = arith.select %49, %50, %48 : vector<4x16x16xf32>
    %c7_i32 = arith.constant 7 : i32
    %52 = arith.cmpi sge, %6, %c7_i32 : i32
    %53 = vector.extract_strided_slice %32 {offsets = [0, 0, 7], sizes = [4, 16, 16], strides = [1, 1, 1]} : vector<4x16x24xf32> to vector<4x16x16xf32>
    %54 = arith.select %52, %53, %51 : vector<4x16x16xf32>
    %c8_i32_19 = arith.constant 8 : i32
    %55 = arith.cmpi sge, %6, %c8_i32_19 : i32
    %56 = vector.extract_strided_slice %32 {offsets = [0, 0, 8], sizes = [4, 16, 16], strides = [1, 1, 1]} : vector<4x16x24xf32> to vector<4x16x16xf32>
    %57 = arith.select %55, %56, %54 : vector<4x16x16xf32>
    %c0_20 = arith.constant 0 : index
    %c0_21 = arith.constant 0 : index
    %c0_22 = arith.constant 0 : index
    %c0_23 = arith.constant 0 : index
    %58 = vector.load %arg3[%c0_20, %c0_21, %c0_22, %c0_23] : memref<1x4x16x16xf32, #tpu.memory_space<vmem>>, vector<1x4x16x16xf32>
    %59 = vector.shape_cast %58 : vector<1x4x16x16xf32> to vector<4x16x16xf32>
    %60 = vector.shape_cast %57 : vector<4x16x16xf32> to vector<1x4x16x16xf32>
    tpu.vector_store %arg3[%c0_20, %c0_21, %c0_22, %c0_23], %60 {strides = array<i32>} : memref<1x4x16x16xf32, #tpu.memory_space<vmem>>, vector<1x4x16x16xf32>,
    return
  }
  func.func @transform_0(%arg0: i32, %arg1: memref<4xi32, #tpu.memory_space<smem>>) -> (i32, i32, i32, i32) {
    %c0_i32 = arith.constant 0 : i32
    %c0_i32_0 = arith.constant 0 : i32
    %c0_i32_1 = arith.constant 0 : i32
    %c0_i32_2 = arith.constant 0 : i32
    return %arg0, %c0_i32, %c0_i32_0, %c0_i32_1 : i32, i32, i32, i32
  }
  func.func @transform_1(%arg0: i32, %arg1: memref<4xi32, #tpu.memory_space<smem>>) -> (i32, i32, i32, i32) {
    %c0_i32 = arith.constant 0 : i32
    %c0_i32_0 = arith.constant 0 : i32
    %c0_i32_1 = arith.constant 0 : i32
    %c0_i32_2 = arith.constant 0 : i32
    return %arg0, %c0_i32, %c0_i32_0, %c0_i32_1 : i32, i32, i32, i32
  }
}

</mosaic_0001>

<bundles_post_ra>
// kernel: tpu_custom_call.1
= control target key start
LH: loop header
LB: loop body
LE: loop exit
PB: predicated region body
PF: predicated region fallthrough
CT: control target
= control target key end

     0   :  { %s1002_s12 = smov [#allocation5]   ;;  %s1533_s0 = inlined_call_operand.hbm [shape: s32[4], index: 0, kind: input, shape index: {}]   ;;  %s1534_s1 = inlined_call_operand.hbm [shape: f32[2,4,16,16], index: 1, kind: input, shape index: {}]   ;;  %s1535_s2 = inlined_call_operand.hbm [shape: f32[2,4,16,16], index: 2, kind: output, shape index: {}]  }
   0x1   :  { %s8_s11 = sshll.u32 %s1533_s0, 4  ;;  %s9_s11 = int_to_ptr.hbm [resolvable:$true] %s8_s11 }
   0x2   :  { %11 = dma.hbm_to_smem %s9_s11, 16, %s1002_s12, [#allocation4] }
   0x3   :  { %976 = dma.done.wait [#allocation4], 16 }
   0x4   :  { %977 = vsyncadd [#allocation4], 4294967280 }
   0x5   :  { %14 = sfence }
   0x6   :  { %15 = vsyncpa [#allocation7], 0 }
   0x7   :  { %17 = vsyncpa [#allocation7 + $0x1], 0 }
   0x8   :  { %18 = vsyncpa [#allocation8], 0 }
   0x9   :  { %20 = vsyncpa [#allocation8 + $0x1], 0  ;;  %s1030_s13 = smov 0   ;;  %s1032_s14 = smov 0  }
   0xa   :  { %s1034_s15 = smov 0   ;;  %s1036_s16 = smov 0  }
   0xb LB: > { %s1051_s0 = sadd.s32 4294967295, %s1000_s16   ;;  %s797_s17 = sadd.s32 4294967294, %s1000_s16   ;;  %s1000_s16 = sphi %s1036_s16, %s1561_s16   ;;  %s996_s15 = sphi %s1034_s15, %s1560_s15   ;;  %s992_s14 = sphi %s1032_s14, %s1559_s14   ;;  %s988_s13 = sphi %s1030_s13, %s1558_s13  }
   0xc   : > { %s1055_s18 = sadd.s32 1, %s1000_s16   ;;  %s33_s19 = sadd.s32 1, %s996_s15 }
   0xd   : > { %s30_s20 = ssub.s32 %s1000_s16, %s1055_s18  ;;  %p40_p0 = scmp.ne.s32.totalorder %s996_s15, %s992_s14 }
   0xe   : > { %p31_p1 = scmp.eq.s32.totalorder %s30_s20, 0  ;;  %p41_p2 = scmp.eq.s32.totalorder %s1000_s16, 0 }
   0xf   : > { %p46_p3 = scmp.ne.s32.totalorder %s992_s14, %s988_s13  ;;  %p47_p4 = scmp.eq.s32.totalorder %s1051_s0, 0 }
  0x10   : > { %s1067_s21 = scalar_select %p31_p1, %s996_s15, %s33_s19  }
  0x11   : > { %p1069_p5 = por %p41_p2, %p40_p0  ;;  %p1073_p6 = por %p47_p4, %p46_p3 }
  0x12   : > { %p70_p7 = scmp.eq.s32.totalorder %s1051_s0, 1  ;;  %p76_p8 = scmp.eq.s32.totalorder %s797_s17, 1 }
  0x13   : > { %p840_p10 = scmp.lt.s32.totalorder %s1000_s16, 2  ;;  %s96_s26 = sand.u32 1, %s996_s15  }
  0x14   : > { %p1080_p11 = por %p70_p7, %p40_p0  ;;  %p1084_p12 = por %p76_p8, %p46_p3 }
  0x15   : > { %s822_s27 = sshll.u32 %s1000_s16, 6  ;;  %s800_s28 = sshll.u32 %s96_s26, 6 }
  0x16   : > { %s105_s3 = scalar_lea.hbm %s1534_s1, %s822_s27  ;;  %s100_s5 = scalar_lea.vmem [#allocation6], %s800_s28 }
  0x17   : > { %s106_s4 = sshll.u32 %s105_s3, 4  ;;  %s108_s6 = sshll.u32 %s100_s5, 4  ;;  %s107_s4 = int_to_ptr.hbm [resolvable:$true] %s106_s4  ;;  %s109_s6 = int_to_ptr.vmem [resolvable:$true] %s108_s6 }
  0x18   : > { %p1095_p13 = pnand %p840_p10, %p1069_p5  ;;  %p803_p0 = scmp.ge.s32.totalorder %s1000_s16, 1 }
  0x19   : > { %p116_p1 = scmp.lt.s32.totalorder %s1000_s16, 3  ;;  %s97_s8 = scalar_lea.sflag [#allocation7], %s96_s26 }
  0x1a   : > { %s902_s9 = sshra.s32 %s107_s4, 4  ;;  %p906_p3 = pneg %p1095_p13  ;;  %s903_s9 = int_to_ptr.hbm [resolvable:$true] %s902_s9 }
  0x1b   : > { %s904_s10 = scalar_lea.hbm %s903_s9, 64  ;;  %s909_s17 = scalar_lea.hbm %s1534_s1, 128 }
  0x1c   : > { %p905_p2 = scmp.ne.s32.totalorder %s903_s9, %s904_s10  ;;  %p910_p5 = scmp.lt.s32.totalorder %s903_s9, %s1534_s1 }
  0x1d   : > { %p911_p8 = scmp.lt.s32.totalorder %s909_s17, %s904_s10 }
  0x1e   : > { %p907_p4 = pnand %p906_p3, %p905_p2 }
  0x1f   : > { %p912_p10 = por %p911_p8, %p910_p5 }
  0x20   : > { %p908_p7 = pneg %p907_p4 }
  0x22   : > { %p913_p9 = pnand %p912_p10, %p908_p7 }
  0x24   : > { %916 = shalt.err (!%p913_p9)
}
  0x25   : > { %s1003_s22 = smov 128   ;;  %s1004_s26 = smov 8  }
  0x26   : > { %835 = dma.hbm_to_vmem [thread:$0]  (!%p1095_p13), %s107_s4, 1024, %s109_s6, %s97_s8, %s1003_s22, %s1003_s22, %s1004_s26  }
  0x27   : > { %p117_p2 = pnand %p803_p0, %p116_p1 }
  0x28   : > { %s1116_s27 = sand.u32 (!%p117_p2), 1, %s992_s14  }
  0x29   : > { %120 = sbr.rel (%p117_p2) target bundleno = 1220 (0x4c4), region = 24  ;;  %s804_s28 = sshll.u32 (!%p117_p2), %s1116_s27, 6 }
  0x2a   : > { %s123_s29 = scalar_lea.sflag (!%p117_p2), [#allocation7], %s1116_s27  ;;  %s126_s30 = scalar_lea.vmem (!%p117_p2), [#allocation6], %s804_s28 }
  0x2e   : > { %979 = dma.done.wait (%p1073_p6), %s123_s29, 1024  }
  0x2f   : > { %981 = vsyncadd (%p1073_p6), %s123_s29, 4294966272  ;;  %v1005_v0 = vmov 0   ;;  %s806_s3 = sshll.u32 %s1051_s0, 1  ;;  %vm166_vm0 = vcmask 130048   ;;  %v158_v1 = vld [vmem:[%s126_s30] sm:$0xff]  ;;  %v159_v2 = vld [vmem:[%s126_s30 + $0x8] sm:$0xff] }
  0x30   : > { %886 = vset.pattern.permute.xlu2 %v1005_v0  ;;  %885 = vset.pattern.permute.xlu1 %v1005_v0  ;;  %s152_s4 = sadd.s32 1, %s806_s3  ;;  %167 = vst.msk [vmem:[#allocation2 + $0x4] sm:$0xff] %vm166_vm0, %v158_v1  ;;  %v160_v3 = vld [vmem:[%s126_s30 + $0x10] sm:$0xff]  ;;  %v161_v4 = vld [vmem:[%s126_s30 + $0x18] sm:$0xff]  ;;  %v162_v5 = vld [vmem:[%s126_s30 + $0x20] sm:$0xff]  ;;  %v175_v8 = vperm.slane %v158_v1, 0 }
  0x31   : > { %884 = vset.pattern.permute.xlu0 %v1005_v0  ;;  %s1129_s5 = sld [smem:[#allocation5 + %s152_s4]]  ;;  %168 = vst.msk [vmem:[#allocation2 + $0xc] sm:$0xff] %vm166_vm0, %v159_v2  ;;  %v163_v6 = vld [vmem:[%s126_s30 + $0x28] sm:$0xff]  ;;  %v164_v7 = vld [vmem:[%s126_s30 + $0x30] sm:$0xff]  ;;  %v176_v9 = vperm.slane %v160_v3, 0  ;;  %vm179_vm1 = vcmask 125952  }
  0x32   : > { %169 = vst.msk [vmem:[#allocation2 + $0x1c] sm:$0xff] %vm166_vm0, %v160_v3  ;;  %v165_v10 = vld [vmem:[%s126_s30 + $0x38] sm:$0xff]  ;;  %v177_v11 = vperm.slane %v162_v5, 0  ;;  %v178_v12 = vperm.slane %v164_v7, 0  ;;  %v184_v13 = vperm.slane %v159_v2, 7  ;;  %v185_v14 = vperm.slane %v161_v4, 7 }
  0x33   : > { %170 = vst.msk [vmem:[#allocation2 + $0x24] sm:$0xff] %vm166_vm0, %v161_v4  ;;  %v186_v15 = vperm.slane %v163_v6, 7  ;;  %v187_v16 = vperm.slane %v165_v10, 7  ;;  %s1006_s6 = smov 4   ;;  %v1007_v25 = vmov 15   ;;  %vm306_vm2 = vcmask 162816  }
  0x34   : > { %171 = vst.msk [vmem:[#allocation2 + $0x34] sm:$0xff] %vm166_vm0, %v162_v5  ;;  %vm297_vm3 = vcmask 31744   ;;  %s1008_s7 = smov 1   ;;  %s147_s8 = sld [smem:[#allocation5 + %s806_s3]] }
  0x35   : > { %172 = vst.msk [vmem:[#allocation2 + $0x3c] sm:$0xff] %vm166_vm0, %v163_v6  ;;  %s1009_s29 = smov 120   ;;  %s145_s30 = scalar_lea.vmem [#allocation9], %s804_s28 }
  0x36   : > { %173 = vst.msk [vmem:[#allocation2 + $0x4c] sm:$0xff] %vm166_vm0, %v164_v7  ;;  %s827_s3 = sshll.u32 %s1051_s0, 6  ;;  %s708_s0 = scalar_lea.sflag [#allocation8], %s1116_s27 }
  0x37   : > { %p154_p6 = scmp.gt.s32.totalorder %s1129_s5, 0  ;;  %174 = vst.msk [vmem:[#allocation2 + $0x54] sm:$0xff] %vm166_vm0, %v165_v10  ;;  %p812_p9 = scmp.lt.s32.totalorder %s1129_s5, 8 }
  0x38   : > { %180 = vst.msk [vmem:[#allocation2] sm:$0xf] %vm179_vm1, %v175_v8  ;;  %s719_s28 = scalar_lea.hbm %s1535_s2, %s827_s3 }
  0x39   : > { %181 = vst.msk [vmem:[#allocation2 + $0x18] sm:$0xf] %vm179_vm1, %v176_v9  ;;  %s1563_s5 = smov (!%p154_p6, %s1129_s5), 0 }
  0x3a   : > { %182 = vst.msk [vmem:[#allocation2 + $0x30] sm:$0xf] %vm179_vm1, %v177_v11  ;;  %s1565_s5 = smov (!%p812_p9, %s1563_s5), 8  ;;  %p148_p13 = scmp.gt.s32.totalorder %s147_s8, 0 }
  0x3b   : > { %183 = vst.msk [vmem:[#allocation2 + $0x48] sm:$0xf] %vm179_vm1, %v178_v12  ;;  %s192_s23 = scalar_lea.vmem [#allocation2], %s1565_s5  ;;  %p807_p0 = scmp.lt.s32.totalorder %s147_s8, 8 }
  0x3c   : > { %188 = vst.msk [vmem:[#allocation2 + $0x14] sm:$0xf] %vm179_vm1, %v184_v13  ;;  %s149_s9 = scalar_select %p148_p13, %s147_s8, 0 }
  0x3d   : > { %189 = vst.msk [vmem:[#allocation2 + $0x2c] sm:$0xf] %vm179_vm1, %v185_v14 }
  0x3e   : > { %190 = vst.msk [vmem:[#allocation2 + $0x44] sm:$0xf] %vm179_vm1, %v186_v15  ;;  %s1567_s9 = smov (!%p807_p0, %s149_s9), 8 }
  0x3f   : > { %191 = vst.msk [vmem:[#allocation2 + $0x5c] sm:$0xf] %vm179_vm1, %v187_v16  ;;  %p315_p1 = scmp.ge.s32.totalorder %s1567_s9, 1  ;;  %p359_p3 = scmp.ge.s32.totalorder %s1567_s9, 2 }
  0x40   : > { %p403_p4 = scmp.ge.s32.totalorder %s1567_s9, 3  ;;  %p447_p7 = scmp.ge.s32.totalorder %s1567_s9, 4 }
  0x41   : > { %s316_s10 = scalar_select %p315_p1, 1, 0 }
  0x42   : > { %s360_s11 = scalar_select %p359_p3, 1, 0 }
  0x43   : > { %v317_v2 = vstv %s316_s10  ;;  %s404_s12 = scalar_select %p403_p4, 1, 0 }
  0x44   : > { %vm1203_vm4 = vcmp.eq.s32.totalorder %v317_v2, 1  ;;  %s448_s17 = scalar_select %p447_p7, 1, 0 }
  0x45   : > { %p491_p5 = scmp.ge.s32.totalorder %s1567_s9, 5  ;;  %p535_p8 = scmp.ge.s32.totalorder %s1567_s9, 6 }
  0x46   : > { %v197_v17 = vld [vmem:[%s192_s23 + $0x30] sm:$0xff]  ;;  %v195_v18 = vld [vmem:[%s192_s23 + $0x18] sm:$0xff]  ;;  %v193_v19 = vld [vmem:[%s192_s23] sm:$0xff]  ;;  %p579_p10 = scmp.ge.s32.totalorder %s1567_s9, 7  ;;  %p623_p2 = scmp.ge.s32.totalorder %s1567_s9, 8 }
  0x47   : > { %223 = vperm.xlu2 %886, %v197_v17   ;;  %213 = vperm.xlu1 %885, %v195_v18   ;;  %v198_v20 = vld [vmem:[%s192_s23 + $0x38] sm:$0xff]  ;;  %v196_v21 = vld [vmem:[%s192_s23 + $0x20] sm:$0xff]  ;;  %v194_v22 = vld [vmem:[%s192_s23 + $0x8] sm:$0xff]  ;;  %s492_s19 = scalar_select %p491_p5, 1, 0 }
  0x48   : > { %203 = vperm.xlu0 %884, %v193_v19   ;;  %v200_v23 = vld [vmem:[%s192_s23 + $0x50] sm:$0xff]  ;;  %v199_v24 = vld [vmem:[%s192_s23 + $0x48] sm:$0xff]  ;;  %s536_s20 = scalar_select %p535_p8, 1, 0 }
  0x49   : > { %s580_s22 = scalar_select %p579_p10, 1, 0 }
  0x4a   : > { %s624_s26 = scalar_select %p623_p2, 1, 0 }
  0x4b   : > { %s720_s23 = sshll.u32 %s145_s30, 4  ;;  %s721_s23 = int_to_ptr.vmem [resolvable:$true] %s720_s23 }
  0x4f   : > { %228 = vperm.xlu2 %886, %v198_v20   ;;  %218 = vperm.xlu1 %885, %v196_v21  }
  0x50   : > { %208 = vperm.xlu0 %884, %v194_v22  }
  0x57   : > { %238 = vperm.xlu1 %885, %v200_v23   ;;  %273 = vrot.lane.b32.xlu2 %v193_v19, %s1006_s6 }
  0x58   : > { %233 = vperm.xlu0 %884, %v199_v24   ;;  %888 = vset.pattern.permute.xlu2 %v1007_v25 }
  0x5f   : > { %277 = vrot.lane.b32.xlu1 %v195_v18, %s1006_s6  ;;  %279 = vrot.lane.b32.xlu2 %v196_v21, %s1006_s6 }
  0x60   : > { %275 = vrot.lane.b32.xlu0 %v194_v22, %s1006_s6  ;;  %887 = vset.pattern.permute.xlu1 %v1007_v25 }
  0x61   : > { %889 = vset.pattern.permute.xlu0 %v1007_v25 }
  0x67   : > { %283 = vrot.lane.b32.xlu1 %v198_v20, %s1006_s6  ;;  %285 = vrot.lane.b32.xlu2 %v199_v24, %s1006_s6 }
  0x68   : > { %281 = vrot.lane.b32.xlu0 %v197_v17, %s1006_s6 }
  0x6f   : > { %242 = vperm.xlu1 %887, %v193_v19   ;;  %246 = vperm.xlu2 %888, %v194_v22  }
  0x70   : > { %287 = vrot.lane.b32.xlu0 %v200_v23, %s1006_s6  ;;  %s722_s6 = sshll.u32 %s719_s28, 4  ;;  %s723_s6 = int_to_ptr.hbm [resolvable:$true] %s722_s6 }
  0x77   : > { %254 = vperm.xlu1 %887, %v196_v21   ;;  %258 = vperm.xlu2 %888, %v197_v17  }
  0x78   : > { %250 = vperm.xlu0 %889, %v195_v18  }
  0x7f   : > { %262 = vperm.xlu1 %887, %v198_v20   ;;  %266 = vperm.xlu2 %888, %v199_v24   ;;  %v361_v20 = vstv %s360_s11  ;;  %s952_s11 = scalar_lea.hbm %s1535_s2, 128 }
  0x80   : > { %270 = vperm.xlu0 %889, %v200_v23   ;;  %vm1240_vm5 = vcmp.eq.s32.totalorder %v361_v20, 1 }
  0xa1   : > { %v224_v26 = vpop.permute.xlu2 %223 }
  0xa9   : > { %v229_v27 = vpop.permute.xlu2 %228 }
  0xb1   : > { %v274_v28 = vpop.permute.xlu2 %273 }
  0xb9   : > { %v214_v29 = vpop.permute.xlu1 %213  ;;  %v280_v31 = vpop.permute.xlu2 %279 }
  0xba   : > { %v204_v30 = vpop.permute.xlu0 %203 }
  0xbb   : > { %v298_v47 = vsel %vm297_vm3, %v204_v30, %v274_v28 }
  0xc1   : > { %v219_v32 = vpop.permute.xlu1 %218  ;;  %v286_v34 = vpop.permute.xlu2 %285 }
  0xc2   : > { %v209_v33 = vpop.permute.xlu0 %208  ;;  %v301_v51 = vsel %vm297_vm3, %v219_v32, %v280_v31 }
  0xc9   : > { %v239_v35 = vpop.permute.xlu1 %238  ;;  %v247_v37 = vpop.permute.xlu2 %246 }
  0xca   : > { %v234_v36 = vpop.permute.xlu0 %233 }
  0xcb   : > { %v304_v58 = vsel %vm297_vm3, %v234_v36, %v286_v34 }
  0xd1   : > { %v278_v38 = vpop.permute.xlu1 %277  ;;  %v259_v44 = vpop.permute.xlu2 %258 }
  0xd2   : > { %v276_v39 = vpop.permute.xlu0 %275  ;;  %v300_v53 = vsel %vm297_vm3, %v214_v29, %v278_v38  ;;  %v405_v38 = vstv %s404_s12 }
  0xd3   : > { %v299_v40 = vsel %vm297_vm3, %v209_v33, %v276_v39  ;;  %vm1277_vm6 = vcmp.eq.s32.totalorder %v405_v38, 1 }
  0xd4   : > { %v1152_v41 = vsel %vm306_vm2, %v299_v40, %v247_v37 }
  0xd5   : > { %329 = vrot.lane.b32.xlu2 %v1152_v41, %s1008_s7 }
  0xd9   : > { %v284_v42 = vpop.permute.xlu1 %283  ;;  %v267_v57 = vpop.permute.xlu2 %266 }
  0xda   : > { %v282_v43 = vpop.permute.xlu0 %281  ;;  %v303_v59 = vsel %vm297_vm3, %v229_v27, %v284_v42  ;;  %v1183_v61 = vsel %vm306_vm2, %v304_v58, %v267_v57 }
  0xdb   : > { %v302_v45 = vsel %vm297_vm3, %v224_v26, %v282_v43 }
  0xdc   : > { %v1158_v46 = vsel %vm306_vm2, %v302_v45, %v259_v44 }
  0xdd   : > { %335 = vrot.lane.b32.xlu2 %v1158_v46, %s1008_s7 }
  0xe1   : > { %v243_v48 = vpop.permute.xlu1 %242 }
  0xe2   : > { %v1164_v49 = vsel %vm306_vm2, %v298_v47, %v243_v48  ;;  %v288_v50 = vpop.permute.xlu0 %287 }
  0xe3   : > { %327 = vrot.lane.b32.xlu1 %v1164_v49, %s1008_s7  ;;  %v305_v62 = vsel %vm297_vm3, %v239_v35, %v288_v50 }
  0xe9   : > { %v255_v52 = vpop.permute.xlu1 %254 }
  0xea   : > { %v1171_v54 = vsel %vm306_vm2, %v301_v51, %v255_v52  ;;  %v251_v55 = vpop.permute.xlu0 %250 }
  0xeb   : > { %v1174_v56 = vsel %vm306_vm2, %v300_v53, %v251_v55  ;;  %333 = vrot.lane.b32.xlu1 %v1171_v54, %s1008_s7 }
  0xec   : > { %331 = vrot.lane.b32.xlu0 %v1174_v56, %s1008_s7 }
  0xf1   : > { %v263_v60 = vpop.permute.xlu1 %262 }
  0xf2   : > { %v1187_v63 = vsel %vm306_vm2, %v303_v59, %v263_v60  ;;  %v271_v0 = vpop.permute.xlu0 %270 }
  0xf3   : > { %v1190_v1 = vsel %vm306_vm2, %v305_v62, %v271_v0  ;;  %339 = vrot.lane.b32.xlu1 %v1183_v61, %s1008_s7  ;;  %v449_v62 = vstv %s448_s17 }
  0xf4   : > { %337 = vrot.lane.b32.xlu0 %v1187_v63, %s1008_s7  ;;  %341 = vrot.lane.b32.xlu2 %v1190_v1, %s1008_s7  ;;  %vm1314_vm7 = vcmp.eq.s32.totalorder %v449_v62, 1 }
 0x12f   : > { %v330_v4 = vpop.permute.xlu2 %329 }
 0x130   : > { %v352_v5 = vsel %vm1203_vm4, %v1152_v41, %v330_v4 }
 0x131   : > { %373 = vrot.lane.b32.xlu1 %v352_v5, %s1008_s7 }
 0x137   : > { %v336_v6 = vpop.permute.xlu2 %335 }
 0x138   : > { %v355_v7 = vsel %vm1203_vm4, %v1158_v46, %v336_v6 }
 0x139   : > { %379 = vrot.lane.b32.xlu1 %v355_v7, %s1008_s7 }
 0x14e   : > { %v342_v8 = vpop.permute.xlu2 %341 }
 0x14f   : > { %v358_v9 = vsel %vm1203_vm4, %v1190_v1, %v342_v8 }
 0x150   : > { %385 = vrot.lane.b32.xlu1 %v358_v9, %s1008_s7 }
 0x155   : > { %v328_v10 = vpop.permute.xlu1 %327 }
 0x156   : > { %v351_v11 = vsel %vm1203_vm4, %v1164_v49, %v328_v10 }
 0x157   : > { %371 = vrot.lane.b32.xlu0 %v351_v11, %s1008_s7 }
 0x15d   : > { %v334_v12 = vpop.permute.xlu1 %333 }
 0x15e   : > { %v332_v13 = vpop.permute.xlu0 %331  ;;  %v354_v14 = vsel %vm1203_vm4, %v1171_v54, %v334_v12 }
 0x15f   : > { %v353_v15 = vsel %vm1203_vm4, %v1174_v56, %v332_v13  ;;  %377 = vrot.lane.b32.xlu0 %v354_v14, %s1008_s7 }
 0x160   : > { %375 = vrot.lane.b32.xlu2 %v353_v15, %s1008_s7 }
 0x165   : > { %v340_v16 = vpop.permute.xlu1 %339 }
 0x166   : > { %v338_v17 = vpop.permute.xlu0 %337  ;;  %v357_v18 = vsel %vm1203_vm4, %v1183_v61, %v340_v16 }
 0x167   : > { %v356_v19 = vsel %vm1203_vm4, %v1187_v63, %v338_v17  ;;  %383 = vrot.lane.b32.xlu0 %v357_v18, %s1008_s7  ;;  %v493_v18 = vstv %s492_s19 }
 0x168   : > { %381 = vrot.lane.b32.xlu2 %v356_v19, %s1008_s7  ;;  %vm1351_vm8 = vcmp.eq.s32.totalorder %v493_v18, 1 }
 0x1a3   : > { %v374_v22 = vpop.permute.xlu1 %373 }
 0x1a4   : > { %v396_v23 = vsel %vm1240_vm5, %v1152_v41, %v374_v22 }
 0x1a5   : > { %417 = vrot.lane.b32.xlu0 %v396_v23, %s1008_s7 }
 0x1ab   : > { %v380_v24 = vpop.permute.xlu1 %379 }
 0x1ac   : > { %v399_v25 = vsel %vm1240_vm5, %v1158_v46, %v380_v24 }
 0x1ad   : > { %423 = vrot.lane.b32.xlu0 %v399_v25, %s1008_s7 }
 0x1ba   : > { %v376_v26 = vpop.permute.xlu2 %375 }
 0x1bb   : > { %v397_v27 = vsel %vm1240_vm5, %v1174_v56, %v376_v26 }
 0x1bc   : > { %419 = vrot.lane.b32.xlu1 %v397_v27, %s1008_s7 }
 0x1c2   : > { %v382_v28 = vpop.permute.xlu2 %381  ;;  %v386_v29 = vpop.permute.xlu1 %385 }
 0x1c3   : > { %v400_v30 = vsel %vm1240_vm5, %v1187_v63, %v382_v28  ;;  %v402_v31 = vsel %vm1240_vm5, %v1190_v1, %v386_v29 }
 0x1c4   : > { %425 = vrot.lane.b32.xlu1 %v400_v30, %s1008_s7  ;;  %429 = vrot.lane.b32.xlu0 %v402_v31, %s1008_s7 }
 0x1c9   : > { %v372_v32 = vpop.permute.xlu0 %371 }
 0x1ca   : > { %v395_v33 = vsel %vm1240_vm5, %v1164_v49, %v372_v32 }
 0x1cb   : > { %415 = vrot.lane.b32.xlu2 %v395_v33, %s1008_s7 }
 0x1d1   : > { %v378_v34 = vpop.permute.xlu0 %377 }
 0x1d2   : > { %v398_v35 = vsel %vm1240_vm5, %v1171_v54, %v378_v34 }
 0x1d3   : > { %421 = vrot.lane.b32.xlu2 %v398_v35, %s1008_s7 }
 0x1d9   : > { %v384_v36 = vpop.permute.xlu0 %383 }
 0x1da   : > { %v401_v37 = vsel %vm1240_vm5, %v1183_v61, %v384_v36  ;;  %v537_v36 = vstv %s536_s20 }
 0x1db   : > { %427 = vrot.lane.b32.xlu2 %v401_v37, %s1008_s7  ;;  %vm1388_vm9 = vcmp.eq.s32.totalorder %v537_v36, 1 }
 0x217   : > { %v418_v40 = vpop.permute.xlu0 %417 }
 0x218   : > { %v440_v42 = vsel %vm1277_vm6, %v1152_v41, %v418_v40 }
 0x219   : > { %461 = vrot.lane.b32.xlu2 %v440_v42, %s1008_s7 }
 0x21f   : > { %v424_v43 = vpop.permute.xlu0 %423 }
 0x220   : > { %v443_v44 = vsel %vm1277_vm6, %v1158_v46, %v424_v43 }
 0x221   : > { %467 = vrot.lane.b32.xlu2 %v443_v44, %s1008_s7 }
 0x225   : > { %v416_v45 = vpop.permute.xlu2 %415 }
 0x226   : > { %v439_v47 = vsel %vm1277_vm6, %v1164_v49, %v416_v45 }
 0x227   : > { %459 = vrot.lane.b32.xlu1 %v439_v47, %s1008_s7 }
 0x22d   : > { %v422_v48 = vpop.permute.xlu2 %421 }
 0x22e   : > { %v420_v50 = vpop.permute.xlu1 %419  ;;  %v442_v51 = vsel %vm1277_vm6, %v1171_v54, %v422_v48 }
 0x22f   : > { %v441_v52 = vsel %vm1277_vm6, %v1174_v56, %v420_v50  ;;  %465 = vrot.lane.b32.xlu1 %v442_v51, %s1008_s7 }
 0x230   : > { %463 = vrot.lane.b32.xlu0 %v441_v52, %s1008_s7 }
 0x235   : > { %v428_v53 = vpop.permute.xlu2 %427 }
 0x236   : > { %v426_v55 = vpop.permute.xlu1 %425  ;;  %v430_v57 = vpop.permute.xlu0 %429  ;;  %v445_v58 = vsel %vm1277_vm6, %v1183_v61, %v428_v53 }
 0x237   : > { %v444_v59 = vsel %vm1277_vm6, %v1187_v63, %v426_v55  ;;  %471 = vrot.lane.b32.xlu1 %v445_v58, %s1008_s7  ;;  %v446_v60 = vsel %vm1277_vm6, %v1190_v1, %v430_v57 }
 0x238   : > { %469 = vrot.lane.b32.xlu0 %v444_v59, %s1008_s7  ;;  %473 = vrot.lane.b32.xlu2 %v446_v60, %s1008_s7  ;;  %v581_v59 = vstv %s580_s22 }
 0x239   : > { %vm1425_vm10 = vcmp.eq.s32.totalorder %v581_v59, 1 }
 0x273   : > { %v462_v2 = vpop.permute.xlu2 %461 }
 0x274   : > { %v484_v3 = vsel %vm1314_vm7, %v1152_v41, %v462_v2 }
 0x275   : > { %505 = vrot.lane.b32.xlu1 %v484_v3, %s1008_s7 }
 0x27b   : > { %v468_v4 = vpop.permute.xlu2 %467 }
 0x27c   : > { %v487_v5 = vsel %vm1314_vm7, %v1158_v46, %v468_v4 }
 0x27d   : > { %511 = vrot.lane.b32.xlu1 %v487_v5, %s1008_s7 }
 0x292   : > { %v474_v6 = vpop.permute.xlu2 %473 }
 0x293   : > { %v490_v7 = vsel %vm1314_vm7, %v1190_v1, %v474_v6 }
 0x294   : > { %517 = vrot.lane.b32.xlu1 %v490_v7, %s1008_s7 }
 0x299   : > { %v460_v8 = vpop.permute.xlu1 %459 }
 0x29a   : > { %v483_v9 = vsel %vm1314_vm7, %v1164_v49, %v460_v8 }
 0x29b   : > { %503 = vrot.lane.b32.xlu0 %v483_v9, %s1008_s7 }
 0x2a1   : > { %v466_v10 = vpop.permute.xlu1 %465 }
 0x2a2   : > { %v464_v11 = vpop.permute.xlu0 %463  ;;  %v486_v12 = vsel %vm1314_vm7, %v1171_v54, %v466_v10 }
 0x2a3   : > { %509 = vrot.lane.b32.xlu0 %v486_v12, %s1008_s7  ;;  %v485_v13 = vsel %vm1314_vm7, %v1174_v56, %v464_v11 }
 0x2a4   : > { %507 = vrot.lane.b32.xlu2 %v485_v13, %s1008_s7 }
 0x2a9   : > { %v472_v14 = vpop.permute.xlu1 %471 }
 0x2aa   : > { %v470_v15 = vpop.permute.xlu0 %469  ;;  %v489_v16 = vsel %vm1314_vm7, %v1183_v61, %v472_v14 }
 0x2ab   : > { %515 = vrot.lane.b32.xlu0 %v489_v16, %s1008_s7  ;;  %v488_v17 = vsel %vm1314_vm7, %v1187_v63, %v470_v15  ;;  %v625_v16 = vstv %s624_s26 }
 0x2ac   : > { %513 = vrot.lane.b32.xlu2 %v488_v17, %s1008_s7  ;;  %vm1462_vm11 = vcmp.eq.s32.totalorder %v625_v16, 1 }
 0x2e7   : > { %v506_v20 = vpop.permute.xlu1 %505 }
 0x2e8   : > { %v528_v21 = vsel %vm1351_vm8, %v1152_v41, %v506_v20 }
 0x2e9   : > { %549 = vrot.lane.b32.xlu0 %v528_v21, %s1008_s7 }
 0x2ef   : > { %v512_v22 = vpop.permute.xlu1 %511 }
 0x2f0   : > { %v531_v23 = vsel %vm1351_vm8, %v1158_v46, %v512_v22 }
 0x2f1   : > { %555 = vrot.lane.b32.xlu0 %v531_v23, %s1008_s7 }
 0x2fe   : > { %v508_v24 = vpop.permute.xlu2 %507 }
 0x2ff   : > { %v529_v25 = vsel %vm1351_vm8, %v1174_v56, %v508_v24 }
 0x300   : > { %551 = vrot.lane.b32.xlu1 %v529_v25, %s1008_s7 }
 0x306   : > { %v518_v26 = vpop.permute.xlu1 %517  ;;  %v514_v27 = vpop.permute.xlu2 %513 }
 0x307   : > { %v534_v28 = vsel %vm1351_vm8, %v1190_v1, %v518_v26  ;;  %v532_v29 = vsel %vm1351_vm8, %v1187_v63, %v514_v27 }
 0x308   : > { %561 = vrot.lane.b32.xlu0 %v534_v28, %s1008_s7  ;;  %557 = vrot.lane.b32.xlu1 %v532_v29, %s1008_s7 }
 0x30d   : > { %v504_v30 = vpop.permute.xlu0 %503 }
 0x30e   : > { %v527_v31 = vsel %vm1351_vm8, %v1164_v49, %v504_v30 }
 0x30f   : > { %547 = vrot.lane.b32.xlu2 %v527_v31, %s1008_s7 }
 0x315   : > { %v510_v32 = vpop.permute.xlu0 %509 }
 0x316   : > { %v530_v33 = vsel %vm1351_vm8, %v1171_v54, %v510_v32 }
 0x317   : > { %553 = vrot.lane.b32.xlu2 %v530_v33, %s1008_s7 }
 0x31d   : > { %v516_v34 = vpop.permute.xlu0 %515 }
 0x31e   : > { %v533_v35 = vsel %vm1351_vm8, %v1183_v61, %v516_v34 }
 0x31f   : > { %559 = vrot.lane.b32.xlu2 %v533_v35, %s1008_s7 }
 0x35b   : > { %v550_v38 = vpop.permute.xlu0 %549 }
 0x35c   : > { %v572_v39 = vsel %vm1388_vm9, %v1152_v41, %v550_v38 }
 0x35d   : > { %593 = vrot.lane.b32.xlu2 %v572_v39, %s1008_s7 }
 0x363   : > { %v556_v40 = vpop.permute.xlu0 %555 }
 0x364   : > { %v575_v42 = vsel %vm1388_vm9, %v1158_v46, %v556_v40 }
 0x365   : > { %599 = vrot.lane.b32.xlu2 %v575_v42, %s1008_s7 }
 0x369   : > { %v548_v43 = vpop.permute.xlu2 %547 }
 0x36a   : > { %v571_v44 = vsel %vm1388_vm9, %v1164_v49, %v548_v43 }
 0x36b   : > { %591 = vrot.lane.b32.xlu1 %v571_v44, %s1008_s7 }
 0x371   : > { %v554_v45 = vpop.permute.xlu2 %553 }
 0x372   : > { %v552_v47 = vpop.permute.xlu1 %551  ;;  %v574_v48 = vsel %vm1388_vm9, %v1171_v54, %v554_v45 }
 0x373   : > { %v573_v50 = vsel %vm1388_vm9, %v1174_v56, %v552_v47  ;;  %597 = vrot.lane.b32.xlu1 %v574_v48, %s1008_s7 }
 0x374   : > { %595 = vrot.lane.b32.xlu0 %v573_v50, %s1008_s7 }
 0x379   : > { %v560_v51 = vpop.permute.xlu2 %559 }
 0x37a   : > { %v558_v52 = vpop.permute.xlu1 %557  ;;  %v562_v53 = vpop.permute.xlu0 %561  ;;  %v577_v55 = vsel %vm1388_vm9, %v1183_v61, %v560_v51 }
 0x37b   : > { %v576_v57 = vsel %vm1388_vm9, %v1187_v63, %v558_v52  ;;  %603 = vrot.lane.b32.xlu1 %v577_v55, %s1008_s7  ;;  %v578_v58 = vsel %vm1388_vm9, %v1190_v1, %v562_v53 }
 0x37c   : > { %601 = vrot.lane.b32.xlu0 %v576_v57, %s1008_s7  ;;  %605 = vrot.lane.b32.xlu2 %v578_v58, %s1008_s7 }
 0x3b7   : > { %v594_v62 = vpop.permute.xlu2 %593 }
 0x3b8   : > { %v616_v0 = vsel %vm1425_vm10, %v1152_v41, %v594_v62 }
 0x3b9   : > { %637 = vrot.lane.b32.xlu1 %v616_v0, %s1008_s7 }
 0x3bf   : > { %v600_v2 = vpop.permute.xlu2 %599 }
 0x3c0   : > { %v619_v3 = vsel %vm1425_vm10, %v1158_v46, %v600_v2 }
 0x3c1   : > { %643 = vrot.lane.b32.xlu1 %v619_v3, %s1008_s7 }
 0x3d6   : > { %v606_v4 = vpop.permute.xlu2 %605 }
 0x3d7   : > { %v622_v5 = vsel %vm1425_vm10, %v1190_v1, %v606_v4 }
 0x3d8   : > { %649 = vrot.lane.b32.xlu1 %v622_v5, %s1008_s7 }
 0x3dd   : > { %v592_v6 = vpop.permute.xlu1 %591 }
 0x3de   : > { %v615_v7 = vsel %vm1425_vm10, %v1164_v49, %v592_v6 }
 0x3df   : > { %635 = vrot.lane.b32.xlu0 %v615_v7, %s1008_s7 }
 0x3e5   : > { %v598_v8 = vpop.permute.xlu1 %597 }
 0x3e6   : > { %v596_v9 = vpop.permute.xlu0 %595  ;;  %v618_v10 = vsel %vm1425_vm10, %v1171_v54, %v598_v8 }
 0x3e7   : > { %641 = vrot.lane.b32.xlu0 %v618_v10, %s1008_s7  ;;  %v617_v11 = vsel %vm1425_vm10, %v1174_v56, %v596_v9 }
 0x3e8   : > { %639 = vrot.lane.b32.xlu2 %v617_v11, %s1008_s7 }
 0x3ed   : > { %v604_v12 = vpop.permute.xlu1 %603 }
 0x3ee   : > { %v602_v13 = vpop.permute.xlu0 %601  ;;  %v621_v14 = vsel %vm1425_vm10, %v1183_v61, %v604_v12 }
 0x3ef   : > { %647 = vrot.lane.b32.xlu0 %v621_v14, %s1008_s7  ;;  %v620_v15 = vsel %vm1425_vm10, %v1187_v63, %v602_v13 }
 0x3f0   : > { %645 = vrot.lane.b32.xlu2 %v620_v15, %s1008_s7  ;;  %s946_s7 = sshra.s32 %s723_s6, 4  ;;  %s947_s7 = int_to_ptr.hbm [resolvable:$true] %s946_s7 }
 0x3f1   : > { %s948_s8 = scalar_lea.hbm %s947_s7, 64  ;;  %p953_p0 = scmp.lt.s32.totalorder %s947_s7, %s1535_s2 }
 0x3f2   : > { %p949_p6 = scmp.ne.s32.totalorder %s947_s7, %s948_s8  ;;  %p954_p1 = scmp.lt.s32.totalorder %s952_s11, %s948_s8 }
 0x3f4   : > { %p950_p9 = pnand %p949_p6, %p1080_p11  ;;  %p955_p3 = por %p954_p1, %p953_p0 }
 0x3f6   : > { %p951_p13 = pneg %p950_p9 }
 0x3f8   : > { %p956_p4 = pnand %p955_p3, %p951_p13 }
 0x42b   : > { %v638_v18 = vpop.permute.xlu1 %637 }
 0x42c   : > { %v660_v19 = vsel %vm1462_vm11, %v1152_v41, %v638_v18 }
 0x42d   : > { %677 = vrot.lane.b32.xlu0 %v660_v19, %s1009_s29 }
 0x433   : > { %v644_v20 = vpop.permute.xlu1 %643 }
 0x434   : > { %v663_v21 = vsel %vm1462_vm11, %v1158_v46, %v644_v20 }
 0x435   : > { %683 = vrot.lane.b32.xlu0 %v663_v21, %s1009_s29 }
 0x442   : > { %v640_v22 = vpop.permute.xlu2 %639 }
 0x443   : > { %v661_v23 = vsel %vm1462_vm11, %v1174_v56, %v640_v22 }
 0x444   : > { %679 = vrot.lane.b32.xlu1 %v661_v23, %s1009_s29 }
 0x44a   : > { %v650_v24 = vpop.permute.xlu1 %649  ;;  %v646_v25 = vpop.permute.xlu2 %645 }
 0x44b   : > { %v666_v41 = vsel %vm1462_vm11, %v1190_v1, %v650_v24  ;;  %v664_v26 = vsel %vm1462_vm11, %v1187_v63, %v646_v25 }
 0x44c   : > { %689 = vrot.lane.b32.xlu0 %v666_v41, %s1009_s29  ;;  %685 = vrot.lane.b32.xlu1 %v664_v26, %s1009_s29 }
 0x451   : > { %v636_v46 = vpop.permute.xlu0 %635 }
 0x452   : > { %v659_v56 = vsel %vm1462_vm11, %v1164_v49, %v636_v46 }
 0x453   : > { %675 = vrot.lane.b32.xlu2 %v659_v56, %s1009_s29 }
 0x459   : > { %v642_v27 = vpop.permute.xlu0 %641 }
 0x45a   : > { %v662_v28 = vsel %vm1462_vm11, %v1171_v54, %v642_v27 }
 0x45b   : > { %681 = vrot.lane.b32.xlu2 %v662_v28, %s1009_s29 }
 0x461   : > { %v648_v1 = vpop.permute.xlu0 %647 }
 0x462   : > { %v665_v63 = vsel %vm1462_vm11, %v1183_v61, %v648_v1 }
 0x463   : > { %687 = vrot.lane.b32.xlu2 %v665_v63, %s1009_s29 }
 0x49f   : > { %v678_v29 = vpop.permute.xlu0 %677 }
 0x4a0   : > { %700 = vst.msk [vmem:[%s145_s30 + $0x8] sm:$0xff] %vm166_vm0, %v678_v29 }
 0x4a7   : > { %v684_v30 = vpop.permute.xlu0 %683 }
 0x4a8   : > { %703 = vst.msk [vmem:[%s145_s30 + $0x20] sm:$0xff] %vm166_vm0, %v684_v30 }
 0x4ad   : > { %v676_v49 = vpop.permute.xlu2 %675 }
 0x4ae   : > { %699 = vst.msk [vmem:[%s145_s30] sm:$0xff] %vm166_vm0, %v676_v49 }
 0x4b5   : > { %v682_v54 = vpop.permute.xlu2 %681 }
 0x4b6   : > { %v680_v31 = vpop.permute.xlu1 %679  ;;  %702 = vst.msk [vmem:[%s145_s30 + $0x18] sm:$0xff] %vm166_vm0, %v682_v54 }
 0x4b7   : > { %701 = vst.msk [vmem:[%s145_s30 + $0x10] sm:$0xff] %vm166_vm0, %v680_v31 }
 0x4bd   : > { %v688_v61 = vpop.permute.xlu2 %687 }
 0x4be   : > { %v686_v32 = vpop.permute.xlu1 %685  ;;  %705 = vst.msk [vmem:[%s145_s30 + $0x30] sm:$0xff] %vm166_vm0, %v688_v61  ;;  %v690_v33 = vpop.permute.xlu0 %689 }
 0x4bf   : > { %704 = vst.msk [vmem:[%s145_s30 + $0x28] sm:$0xff] %vm166_vm0, %v686_v32 }
 0x4c0   : > { %706 = vst.msk [vmem:[%s145_s30 + $0x38] sm:$0xff] %vm166_vm0, %v690_v33 }
 0x4c1   : > { %959 = shalt.err (!%p956_p4)
}
 0x4c2   : > { %s1010_s27 = smov 128   ;;  %s1011_s19 = smov 8  }
 0x4c3   : > { %830 = dma.vmem_to_hbm [thread:$0]  (%p1080_p11), %s721_s23, 1024, %s723_s6, %s708_s0, %s1010_s27, %s1010_s27, %s1011_s19  }
 0x4c4 PF: > { %s737_s20 = sand.u32 1, %s988_s13   ;;  %p1557_p7 = scmp.ge.s32.totalorder %s1000_s16, 2 }
 0x4c5   : > { %s738_s22 = scalar_lea.sflag [#allocation8], %s737_s20 }
 0x4c6   : > { %p837_p5 = pnand %p1557_p7, %p1084_p12 }
 0x4c8   : > { %p838_p8 = pneg %p837_p5 }
 0x4ca   : > { %983 = dma.done.wait (%p838_p8), %s738_s22, 1024  }
 0x4cb   : > { %985 = vsyncadd (%p838_p8), %s738_s22, 4294966272  ;;  %p23_p10 = scmp.ge.s32.totalorder %s1055_s18, 4   ;;  %s1558_s13 = smov %s992_s14 }
 0x4cc   : > { %s1559_s14 = smov %s996_s15  ;;  %s1560_s15 = smov %s1067_s21 }
 0x4cd   : > { %s1561_s16 = smov %s1055_s18  ;;  %25 = sbr.rel (!%p23_p10) target bundleno = 11 (0xb), region = 70 }
 0x4d2   :  { %744 = vsyncpa [#allocation7], 1 }
 0x4d3   :  { %746 = vsyncpa [#allocation7 + $0x1], 1 }
 0x4d4   :  { %747 = vsyncpa [#allocation8], 1 }
 0x4d5   :  { %749 = vsyncpa [#allocation8 + $0x1], 1 }

</bundles_post_ra>
